<compile_context>
chip_gen: v7x
topology: tpu7x:2x2x1
jax: 0.10.0
libtpu: 0.0.40
codegen_flags: <defaults>
</compile_context>

<pallas_src>
import functools

import jax
import jax.numpy as jnp
from jax import lax
from jax.experimental import pallas as pl
from jax.experimental.pallas import tpu as pltpu

LANE = 128
SUBLANE = 8


def _round_up(x, m):
    return ((x + m - 1) // m) * m


def textcnn_kernel(max_fs, lout,
                   emb_ref, mask_ref, wc_ref, bc_ref, wl_ref, bl_ref, out_ref):
    """Fused conv(all filter sizes) -> ReLU -> masked max-pool -> linear -> softmax."""
    emb = emb_ref[...]                       # (TB, Lp, E) bf16, Lp = lout + max_fs - 1
    tb, _, e_dim = emb.shape
    fe = max_fs * e_dim
    kt = mask_ref.shape[1]                   # n_f * Kpad

    # im2col slab built once per batch tile: (TB*Lout, max_fs*E). lout is a
    # multiple of 8, so the (TB, Lout, fe) -> (TB*Lout, fe) merge is
    # sublane-aligned (no relayout).
    x_col = jnp.concatenate(
        [emb[:, dh:dh + lout, :] for dh in range(max_fs)], axis=-1)
    x_col = x_col.reshape(tb * lout, fe)

    # Single lane-dense MXU matmul covering every filter size / output channel.
    acc = jnp.dot(x_col, wc_ref[...], preferred_element_type=jnp.float32)  # (TB*Lout, KT)
    acc = jnp.maximum(acc + bc_ref[...], 0.0)                              # bias + ReLU (f32)

    # Mask positions whose window runs past the original sequence (per filter).
    # Values are >= 0 after ReLU, so zero-masking is exact for the max-pool.
    acc = acc.reshape(tb, lout, kt) * mask_ref[...][None, :, :]
    pooled = jnp.max(acc, axis=1)                                          # (TB, KT) f32

    # Linear + softmax. Padded label columns carry a -1e30 bias -> prob ~ 0.
    logits = jnp.dot(pooled.astype(wl_ref.dtype), wl_ref[...],
                     preferred_element_type=jnp.float32) + bl_ref[...]     # (TB, LSpad)
    m = jnp.max(logits, axis=-1, keepdims=True)
    ex = jnp.exp(logits - m)
    s = jnp.sum(ex, axis=-1, keepdims=True)
    inv = pl.reciprocal(s, approx=True)          # EUP slot (otherwise idle)
    inv = inv * (2.0 - s * inv)                  # one Newton step -> ~f32 accuracy
    out_ref[...] = (ex * inv).astype(out_ref.dtype)


def pack_params(params, filter_sizes):
    """Host-side packing: pre-transposed, zero-padded, lane-dense bf16 operands."""
    e_dim = params["embedding"].shape[1]
    n_f = len(filter_sizes)
    max_fs = max(filter_sizes)
    k_num = params["conv_w_0"].shape[0]
    k_pad = _round_up(k_num, LANE)
    kt = n_f * k_pad
    label_size = params["logistic_b"].shape[0]
    ls_pad = _round_up(label_size, LANE)

    # Conv weights: (K, fs, E) per filter -> one (max_fs*E, n_f*Kpad) matrix.
    wc = jnp.zeros((max_fs, e_dim, n_f, k_pad), jnp.float32)
    bc = jnp.zeros((n_f, k_pad), jnp.float32)
    for i, fs in enumerate(filter_sizes):
        w = params[f"conv_w_{i}"]                                   # (K, fs, E)
        wc = wc.at[:fs, :, i, :k_num].set(jnp.transpose(w, (1, 2, 0)))
        bc = bc.at[i, :k_num].set(params[f"conv_b_{i}"])
    wc = wc.reshape(max_fs * e_dim, kt).astype(jnp.bfloat16)
    bc = bc.reshape(1, kt)                                          # stays f32

    # Linear layer: (LS, n_f*K) -> (n_f*Kpad, LSpad), bias padded with -1e30.
    wl = params["logistic_w"]
    wl_p = jnp.zeros((n_f, k_pad, ls_pad), jnp.float32)
    wl_p = wl_p.at[:, :k_num, :label_size].set(
        wl.T.reshape(n_f, k_num, label_size))
    wl_p = wl_p.reshape(kt, ls_pad).astype(jnp.bfloat16)
    bl_p = jnp.full((1, ls_pad), -1e30, jnp.float32)
    bl_p = bl_p.at[0, :label_size].set(params["logistic_b"])
    return wc, bc, wl_p, bl_p, k_pad, ls_pad


def build_pool_mask(filter_sizes, seq_len, lout_pad, k_pad):
    """(Lout_pad, n_f*Kpad) f32 mask: 1 where the window fits inside seq_len."""
    limit = jnp.concatenate(
        [jnp.full((k_pad,), seq_len - fs + 1, jnp.int32) for fs in filter_sizes])
    t_idx = jnp.arange(lout_pad, dtype=jnp.int32)[:, None]
    return (t_idx < limit[None, :]).astype(jnp.float32)


def _pick_batch_tile(batch, lp, e_dim, lout, fe, kt, vmem_budget=24 << 20):
    """Batch tile sized for the 64 MiB/TC (v7x) VMEM ceiling with headroom."""
    per_row = (2 * lp * e_dim * 2        # double-buffered bf16 emb tile
               + lout * fe * 2           # im2col slab (bf16)
               + 2 * lout * kt * 4)      # conv activation + masked copy (f32)
    cap = max(1, vmem_budget // max(per_row, 1))
    tb = min(batch, LANE, cap)
    if tb >= batch:
        return batch, batch
    tb = max(SUBLANE, (tb // SUBLANE) * SUBLANE)   # keep out-block sublanes aligned
    return tb, _round_up(batch, tb)


def textcnn_forward(x_ids, params, filter_sizes):
    """x_ids: (B, L) int32 token ids. Returns softmax probs (B, label_size)."""
    filter_sizes = tuple(filter_sizes)
    batch, seq_len = x_ids.shape
    e_dim = params["embedding"].shape[1]
    label_size = params["logistic_b"].shape[0]
    n_f = len(filter_sizes)
    max_fs, min_fs = max(filter_sizes), min(filter_sizes)
    assert seq_len >= max_fs, "sequence shorter than the largest filter"

    # Shared sliding-window positions, padded to a sublane multiple so in-kernel
    # reshapes stay layout-preserving. Extra positions are masked in the pool.
    lout = seq_len - min_fs + 1
    lout_pad = _round_up(lout, SUBLANE)
    lp_pad = lout_pad + max_fs - 1

    wc, bc, wl_p, bl_p, k_pad, ls_pad = pack_params(params, filter_sizes)
    kt = n_f * k_pad
    fe = max_fs * e_dim
    mask = build_pool_mask(filter_sizes, seq_len, lout_pad, k_pad)

    # Embedding gather stays in JAX glue; cast to bf16 for the MXU and pad the
    # time axis so the max_fs-wide im2col window never reads out of bounds.
    # TODO(synk): for large B*L, fold the gather into the pipeline with
    # PrefetchScalarGridSpec + a pl.Element row-gather on the embedding table.
    emb = jnp.take(params["embedding"], x_ids, axis=0).astype(jnp.bfloat16)

    tb, bp = _pick_batch_tile(batch, lp_pad, e_dim, lout_pad, fe, kt)
    emb = jnp.pad(emb, ((0, bp - batch), (0, lp_pad - seq_len), (0, 0)))

    kernel = functools.partial(textcnn_kernel, max_fs, lout_pad)

    flops = 2 * bp * lout_pad * fe * kt + 2 * bp * kt * ls_pad
    bytes_accessed = (emb.size * 2 + wc.size * 2 + wl_p.size * 2
                      + bc.size * 4 + bl_p.size * 4 + mask.size * 4
                      + bp * ls_pad * 4)

    out = pl.pallas_call(
        kernel,
        out_shape=jax.ShapeDtypeStruct((bp, ls_pad), jnp.float32),
        grid=(bp // tb,),
        in_specs=[
            pl.BlockSpec((tb, lp_pad, e_dim), lambda b: (b, 0, 0)),  # emb tile (pipelined)
            pl.BlockSpec((lout_pad, kt), lambda b: (0, 0)),          # pool mask (resident)
            pl.BlockSpec((fe, kt), lambda b: (0, 0)),                # packed conv W (resident)
            pl.BlockSpec((1, kt), lambda b: (0, 0)),                 # packed conv bias
            pl.BlockSpec((kt, ls_pad), lambda b: (0, 0)),            # packed linear W
            pl.BlockSpec((1, ls_pad), lambda b: (0, 0)),             # packed linear bias
        ],
        out_specs=pl.BlockSpec((tb, ls_pad), lambda b: (b, 0)),      # lane-dense output
        compiler_params=pltpu.CompilerParams(
            dimension_semantics=("parallel",),
            vmem_limit_bytes=48 * 1024 * 1024),
        cost_estimate=pl.CostEstimate(
            flops=flops, transcendentals=bp * ls_pad,
            bytes_accessed=bytes_accessed),
    )(emb, mask, wc, bc, wl_p, bl_p)

    return out[:batch, :label_size]


def textcnn_reference(x_ids, params, filter_sizes, mxu_dtype=jnp.float32):
    """Pure-JAX reference mirroring the PyTorch forward (eval mode).

    mxu_dtype lets us emulate the kernel's bf16-input / f32-accumulate matmuls.
    """
    emb = jnp.take(params["embedding"], x_ids, axis=0).astype(mxu_dtype)
    batch, seq_len = x_ids.shape
    pooled = []
    for i, fs in enumerate(filter_sizes):
        w = params[f"conv_w_{i}"].astype(mxu_dtype)     # (K, fs, E)
        b = params[f"conv_b_{i}"]
        lout = seq_len - fs + 1
        acc = jnp.zeros((batch, lout, w.shape[0]), jnp.float32)
        for dh in range(fs):
            acc = acc + jnp.einsum("ble,ke->blk", emb[:, dh:dh + lout, :],
                                   w[:, dh, :],
                                   preferred_element_type=jnp.float32)
        acc = jax.nn.relu(acc + b[None, None, :])
        pooled.append(jnp.max(acc, axis=1))
    enc = jnp.concatenate(pooled, axis=-1)
    logits = jnp.dot(enc.astype(mxu_dtype),
                     params["logistic_w"].T.astype(mxu_dtype),
                     preferred_element_type=jnp.float32) + params["logistic_b"]
    return jax.nn.softmax(logits, axis=-1)


def init_params(key, vocab_size, embed_dim, kernel_num, filter_sizes, label_size):
    scope = 0.1
    n_keys = 3 + 2 * len(filter_sizes)
    keys = jax.random.split(key, n_keys)
    params = {
        "embedding": jax.random.uniform(
            keys[0], (vocab_size, embed_dim), jnp.float32, -scope, scope),
        "logistic_w": jax.random.uniform(
            keys[1], (label_size, len(filter_sizes) * kernel_num),
            jnp.float32, -scope, scope),
        "logistic_b": jax.random.uniform(
            keys[2], (label_size,), jnp.float32, -scope, scope),
    }
    for i, fs in enumerate(filter_sizes):
        params[f"conv_w_{i}"] = jax.random.uniform(
            keys[3 + 2 * i], (kernel_num, fs, embed_dim), jnp.float32, -scope, scope)
        params[f"conv_b_{i}"] = jax.random.uniform(
            keys[4 + 2 * i], (kernel_num,), jnp.float32, -scope, scope)
    return params


if __name__ == "__main__":
    # Small, module-consistent config.
    vocab_size = 50
    embed_dim = 32
    kernel_num = 8
    filter_sizes = (3, 4, 5)
    label_size = 4
    batch = 2
    seq_len = 16

    key = jax.random.PRNGKey(0)
    k_param, k_ids = jax.random.split(key)
    params = init_params(k_param, vocab_size, embed_dim, kernel_num,
                         filter_sizes, label_size)
    x_ids = jax.random.randint(k_ids, (batch, seq_len), 0, vocab_size, jnp.int32)

    probs = jax.block_until_ready(textcnn_forward(x_ids, params, filter_sizes))

    ref_bf16 = textcnn_reference(x_ids, params, filter_sizes, jnp.bfloat16)
    ref_f32 = textcnn_reference(x_ids, params, filter_sizes, jnp.float32)

    assert probs.shape == (batch, label_size)
    # Tight check vs. a reference using the same bf16-in / f32-accumulate matmuls.
    assert jnp.allclose(probs, ref_bf16, atol=2e-3, rtol=2e-3), (probs, ref_bf16)
    # Loose check vs. the pure-f32 PyTorch-equivalent reference.
    assert jnp.allclose(probs, ref_f32, atol=3e-2, rtol=3e-2), (probs, ref_f32)
    assert jnp.allclose(jnp.sum(probs, axis=-1), 1.0, atol=1e-3)

    print("KERNEL_OK")
</pallas_src>

<mosaic_0001>
module attributes {stable_mosaic.version = 11 : i64} {
  func.func @textcnn_kernel(%arg0: i32, %arg1: memref<2x20x32xbf16, #tpu.memory_space<vmem>>, %arg2: memref<16x384xf32, #tpu.memory_space<vmem>>, %arg3: memref<160x384xbf16, #tpu.memory_space<vmem>>, %arg4: memref<1x384xf32, #tpu.memory_space<vmem>>, %arg5: memref<384x128xbf16, #tpu.memory_space<vmem>>, %arg6: memref<1x128xf32, #tpu.memory_space<vmem>>, %arg7: memref<2x128xf32, #tpu.memory_space<vmem>>) attributes {dimension_semantics = [#tpu.dimension_semantics<parallel>], iteration_bounds = array<i64: 1>, scalar_prefetch = 0 : i64, scratch_operands = 0 : i64, tpu.core_type = #tpu.core_type<tc>, window_params = [{transform_indices = @transform_0, window_bounds = array<i64: 2, 20, 32>}, {pipeline_mode = #tpu.pipeline_mode<synchronous>, transform_indices = @transform_1, window_bounds = array<i64: 16, 384>}, {pipeline_mode = #tpu.pipeline_mode<synchronous>, transform_indices = @transform_2, window_bounds = array<i64: 160, 384>}, {pipeline_mode = #tpu.pipeline_mode<synchronous>, transform_indices = @transform_3, window_bounds = array<i64: 1, 384>}, {pipeline_mode = #tpu.pipeline_mode<synchronous>, transform_indices = @transform_4, window_bounds = array<i64: 384, 128>}, {pipeline_mode = #tpu.pipeline_mode<synchronous>, transform_indices = @transform_5, window_bounds = array<i64: 1, 128>}, {transform_indices = @transform_6, window_bounds = array<i64: 2, 128>}]} {
    %c0 = arith.constant 0 : index
    %c0_0 = arith.constant 0 : index
    %c0_1 = arith.constant 0 : index
    %0 = vector.load %arg1[%c0, %c0_0, %c0_1] : memref<2x20x32xbf16, #tpu.memory_space<vmem>>, vector<2x20x32xbf16>
    %1 = vector.extract_strided_slice %0 {offsets = [0, 0, 0], sizes = [2, 16, 32], strides = [1, 1, 1]} : vector<2x20x32xbf16> to vector<2x16x32xbf16>
    %2 = vector.extract_strided_slice %0 {offsets = [0, 1, 0], sizes = [2, 16, 32], strides = [1, 1, 1]} : vector<2x20x32xbf16> to vector<2x16x32xbf16>
    %3 = vector.extract_strided_slice %0 {offsets = [0, 2, 0], sizes = [2, 16, 32], strides = [1, 1, 1]} : vector<2x20x32xbf16> to vector<2x16x32xbf16>
    %4 = vector.extract_strided_slice %0 {offsets = [0, 3, 0], sizes = [2, 16, 32], strides = [1, 1, 1]} : vector<2x20x32xbf16> to vector<2x16x32xbf16>
    %5 = vector.extract_strided_slice %0 {offsets = [0, 4, 0], sizes = [2, 16, 32], strides = [1, 1, 1]} : vector<2x20x32xbf16> to vector<2x16x32xbf16>
    %6 = tpu.concatenate %1, %2, %3, %4, %5 in 2 : vector<2x16x32xbf16>, vector<2x16x32xbf16>, vector<2x16x32xbf16>, vector<2x16x32xbf16>, vector<2x16x32xbf16> -> vector<2x16x160xbf16>
    %7 = vector.shape_cast %6 : vector<2x16x160xbf16> to vector<32x160xbf16>
    %c0_2 = arith.constant 0 : index
    %c0_3 = arith.constant 0 : index
    %8 = vector.load %arg3[%c0_2, %c0_3] : memref<160x384xbf16, #tpu.memory_space<vmem>>, vector<160x384xbf16>
    %cst = arith.constant dense<0.000000e+00> : vector<32x384xf32>
    %9 = tpu.matmul %7, %8, %cst {dimension_numbers = #tpu.dot_dimension_numbers<[1], [0], [0], [1], [0, 0, 1, 1], [], []>} : vector<32x160xbf16>, vector<160x384xbf16>, vector<32x384xf32> -> vector<32x384xf32>
    %c0_4 = arith.constant 0 : index
    %c0_5 = arith.constant 0 : index
    %10 = vector.load %arg4[%c0_4, %c0_5] : memref<1x384xf32, #tpu.memory_space<vmem>>, vector<1x384xf32>
    %11 = vector.broadcast %10 : vector<1x384xf32> to vector<32x384xf32>
    %12 = arith.addf %9, %11 : vector<32x384xf32>
    %cst_6 = arith.constant 0.000000e+00 : f32
    %13 = vector.broadcast %cst_6 : f32 to vector<32x384xf32>
    %14 = arith.maximumf %12, %13 : vector<32x384xf32>
    %15 = vector.shape_cast %14 : vector<32x384xf32> to vector<2x16x384xf32>
    %c0_7 = arith.constant 0 : index
    %c0_8 = arith.constant 0 : index
    %16 = vector.load %arg2[%c0_7, %c0_8] : memref<16x384xf32, #tpu.memory_space<vmem>>, vector<16x384xf32>
    %17 = vector.shape_cast %16 : vector<16x384xf32> to vector<1x16x384xf32>
    %18 = vector.broadcast %17 : vector<1x16x384xf32> to vector<2x16x384xf32>
    %19 = arith.mulf %15, %18 : vector<2x16x384xf32>
    %cst_9 = arith.constant dense<0xFF800000> : vector<2x384xf32>
    %20 = vector.multi_reduction <maximumf>, %19, %cst_9 [1] : vector<2x16x384xf32> to vector<2x384xf32>
    %21 = arith.truncf %20 : vector<2x384xf32> to vector<2x384xbf16>
    %c0_10 = arith.constant 0 : index
    %c0_11 = arith.constant 0 : index
    %22 = vector.load %arg5[%c0_10, %c0_11] : memref<384x128xbf16, #tpu.memory_space<vmem>>, vector<384x128xbf16>
    %cst_12 = arith.constant dense<0.000000e+00> : vector<2x128xf32>
    %23 = tpu.matmul %21, %22, %cst_12 {dimension_numbers = #tpu.dot_dimension_numbers<[1], [0], [0], [1], [0, 0, 1, 1], [], []>} : vector<2x384xbf16>, vector<384x128xbf16>, vector<2x128xf32> -> vector<2x128xf32>
    %c0_13 = arith.constant 0 : index
    %c0_14 = arith.constant 0 : index
    %24 = vector.load %arg6[%c0_13, %c0_14] : memref<1x128xf32, #tpu.memory_space<vmem>>, vector<1x128xf32>
    %25 = vector.broadcast %24 : vector<1x128xf32> to vector<2x128xf32>
    %26 = arith.addf %23, %25 : vector<2x128xf32>
    %cst_15 = arith.constant dense<0xFF800000> : vector<2xf32>
    %27 = vector.multi_reduction <maximumf>, %26, %cst_15 [1] : vector<2x128xf32> to vector<2xf32>
    %28 = vector.shape_cast %27 : vector<2xf32> to vector<2x1xf32>
    %29 = vector.broadcast %28 : vector<2x1xf32> to vector<2x128xf32>
    %30 = arith.subf %26, %29 : vector<2x128xf32>
    %31 = math.exp %30 : vector<2x128xf32>
    %cst_16 = arith.constant dense<0.000000e+00> : vector<2xf32>
    %32 = vector.multi_reduction <add>, %31, %cst_16 [1] : vector<2x128xf32> to vector<2xf32>
    %33 = vector.shape_cast %32 : vector<2xf32> to vector<2x1xf32>
    %34 = tpu.reciprocal %33 {approx = true} : vector<2x1xf32> -> vector<2x1xf32>
    %35 = arith.mulf %33, %34 : vector<2x1xf32>
    %cst_17 = arith.constant 2.000000e+00 : f32
    %36 = vector.broadcast %cst_17 : f32 to vector<2x1xf32>
    %37 = arith.subf %36, %35 : vector<2x1xf32>
    %38 = arith.mulf %34, %37 : vector<2x1xf32>
    %39 = vector.broadcast %38 : vector<2x1xf32> to vector<2x128xf32>
    %40 = arith.mulf %31, %39 : vector<2x128xf32>
    %c0_18 = arith.constant 0 : index
    %c0_19 = arith.constant 0 : index
    %41 = vector.load %arg7[%c0_18, %c0_19] : memref<2x128xf32, #tpu.memory_space<vmem>>, vector<2x128xf32>
    tpu.vector_store %arg7[%c0_18, %c0_19], %40 {strides = array<i32>} : memref<2x128xf32, #tpu.memory_space<vmem>>, vector<2x128xf32>,
    return
  }
  func.func @transform_0(%arg0: i32) -> (i32, i32, i32) {
    %c0_i32 = arith.constant 0 : i32
    %c0_i32_0 = arith.constant 0 : i32
    %c0_i32_1 = arith.constant 0 : i32
    return %arg0, %c0_i32, %c0_i32_0 : i32, i32, i32
  }
  func.func @transform_1(%arg0: i32) -> (i32, i32) {
    %c0_i32 = arith.constant 0 : i32
    %c0_i32_0 = arith.constant 0 : i32
    %c0_i32_1 = arith.constant 0 : i32
    return %c0_i32, %c0_i32_0 : i32, i32
  }
  func.func @transform_2(%arg0: i32) -> (i32, i32) {
    %c0_i32 = arith.constant 0 : i32
    %c0_i32_0 = arith.constant 0 : i32
    %c0_i32_1 = arith.constant 0 : i32
    return %c0_i32, %c0_i32_0 : i32, i32
  }
  func.func @transform_3(%arg0: i32) -> (i32, i32) {
    %c0_i32 = arith.constant 0 : i32
    %c0_i32_0 = arith.constant 0 : i32
    %c0_i32_1 = arith.constant 0 : i32
    return %c0_i32, %c0_i32_0 : i32, i32
  }
  func.func @transform_4(%arg0: i32) -> (i32, i32) {
    %c0_i32 = arith.constant 0 : i32
    %c0_i32_0 = arith.constant 0 : i32
    %c0_i32_1 = arith.constant 0 : i32
    return %c0_i32, %c0_i32_0 : i32, i32
  }
  func.func @transform_5(%arg0: i32) -> (i32, i32) {
    %c0_i32 = arith.constant 0 : i32
    %c0_i32_0 = arith.constant 0 : i32
    %c0_i32_1 = arith.constant 0 : i32
    return %c0_i32, %c0_i32_0 : i32, i32
  }
  func.func @transform_6(%arg0: i32) -> (i32, i32) {
    %c0_i32 = arith.constant 0 : i32
    %c0_i32_0 = arith.constant 0 : i32
    return %arg0, %c0_i32 : i32, i32
  }
}

</mosaic_0001>

<bundles_post_ra>
// kernel: tpu_custom_call.1
= control target key start
LH: loop header
LB: loop body
LE: loop exit
PB: predicated region body
PF: predicated region fallthrough
CT: control target
= control target key end

     0   :  { %11 = vsyncpa [#allocation3], 0  ;;  %s1378_s0 = inlined_call_operand.vmem [shape: bf16[2,20,32], index: 0, kind: input, shape index: {}]   ;;  %s1379_s1 = inlined_call_operand.hbm [shape: f32[16,384], index: 1, kind: input, shape index: {}]   ;;  %s1380_s2 = inlined_call_operand.hbm [shape: bf16[160,384], index: 2, kind: input, shape index: {}]   ;;  %s1381_s3 = inlined_call_operand.vmem [shape: f32[1,384], index: 3, kind: input, shape index: {}]   ;;  %s1382_s4 = inlined_call_operand.hbm [shape: bf16[384,128], index: 4, kind: input, shape index: {}]   ;;  %s1383_s5 = inlined_call_operand.vmem [shape: f32[1,128], index: 5, kind: input, shape index: {}]   ;;  %s1384_s6 = inlined_call_operand.hbm [shape: f32[2,128], index: 6, kind: output, shape index: {}]  }
   0x1   :  { %12 = vsyncpa [#allocation6], 0 }
   0x2   :  { %13 = vsyncpa [#allocation4], 0  ;;  %s1206_s21 = smov [#allocation5]   ;;  %s1112_s25 = scalar_lea.hbm %s1380_s2, 3840 }
   0x3   :  { %s33_s22 = sshll.u32 %s1206_s21, 4  ;;  %p1113_p0 = scmp.ne.s32.totalorder %s1380_s2, %s1112_s25  ;;  %s34_s22 = int_to_ptr.vmem [resolvable:$true] %s33_s22 }
   0x4   :  { %p1116_p1 = scmp.lt.u32.totalorder %s1112_s25, %s1380_s2 }
   0x6   :  { %p1118_p2 = pnand %p1116_p1, %p1113_p0 }
   0x8   :  { %1121 = shalt.err (!%p1118_p2)
}
   0x9   :  { %s1122_s30 = scalar_lea.vmem %s34_s22, 3840  ;;  %p1127_p4 = scmp.lt.s32.totalorder %s34_s22, %s34_s22 }
   0xa   :  { %p1123_p3 = scmp.ne.s32.totalorder %s34_s22, %s1122_s30  ;;  %p1128_p5 = scmp.lt.s32.totalorder %s1122_s30, %s1122_s30 }
   0xc   :  { %p1129_p6 = por %p1128_p5, %p1127_p4 }
   0xe   :  { %p1130_p7 = pnand %p1129_p6, %p1123_p3 }
  0x10   :  { %1133 = shalt.err (!%p1130_p7)
}
  0x11   :  { %s1207_s7 = smov 192   ;;  %s1208_s8 = smov 12  }
  0x12   :  { %39 = dma.hbm_to_vmem [thread:$0]  %s1380_s2, 3840, %s34_s22, [#allocation6], %s1207_s7, %s1207_s7, %s1208_s8  }
  0x13   :  { %s1209_s11 = smov [#allocation2]   ;;  %s1134_s15 = scalar_lea.hbm %s1379_s1, 768 }
  0x14   :  { %s21_s12 = sshll.u32 %s1209_s11, 4  ;;  %p1135_p8 = scmp.ne.s32.totalorder %s1379_s1, %s1134_s15  ;;  %s22_s12 = int_to_ptr.vmem [resolvable:$true] %s21_s12 }
  0x15   :  { %p1138_p9 = scmp.lt.u32.totalorder %s1134_s15, %s1379_s1 }
  0x17   :  { %p1140_p10 = pnand %p1138_p9, %p1135_p8 }
  0x19   :  { %1143 = shalt.err (!%p1140_p10)
}
  0x1a   :  { %s1144_s20 = scalar_lea.vmem %s22_s12, 768  ;;  %p1149_p12 = scmp.lt.s32.totalorder %s22_s12, %s22_s12 }
  0x1b   :  { %p1145_p11 = scmp.ne.s32.totalorder %s22_s12, %s1144_s20  ;;  %p1150_p13 = scmp.lt.s32.totalorder %s1144_s20, %s1144_s20 }
  0x1d   :  { %p1151_p0 = por %p1150_p13, %p1149_p12 }
  0x1f   :  { %p1152_p1 = pnand %p1151_p0, %p1145_p11 }
  0x21   :  { %1155 = shalt.err (!%p1152_p1)
}
  0x22   :  { %s1210_s2 = smov 384   ;;  %s1211_s21 = smov 24  }
  0x23   :  { %27 = dma.hbm_to_vmem [thread:$0]  %s1379_s1, 768, %s22_s12, [#allocation3], %s1210_s2, %s1210_s2, %s1211_s21  }
  0x24   :  { %s1212_s24 = smov [#allocation7]   ;;  %s1156_s28 = scalar_lea.hbm %s1382_s4, 3072 }
  0x25   :  { %s47_s25 = sshll.u32 %s1212_s24, 4  ;;  %p1157_p2 = scmp.ne.s32.totalorder %s1382_s4, %s1156_s28  ;;  %s48_s25 = int_to_ptr.vmem [resolvable:$true] %s47_s25 }
  0x26   :  { %p1160_p3 = scmp.lt.u32.totalorder %s1156_s28, %s1382_s4 }
  0x28   :  { %p1162_p4 = pnand %p1160_p3, %p1157_p2 }
  0x2a   :  { %1165 = shalt.err (!%p1162_p4)
}
  0x2b   :  { %s1166_s9 = scalar_lea.vmem %s48_s25, 3072  ;;  %p1171_p6 = scmp.lt.s32.totalorder %s48_s25, %s48_s25 }
  0x2c   :  { %p1167_p5 = scmp.ne.s32.totalorder %s48_s25, %s1166_s9  ;;  %p1172_p7 = scmp.lt.s32.totalorder %s1166_s9, %s1166_s9 }
  0x2e   :  { %p1173_p8 = por %p1172_p7, %p1171_p6 }
  0x30   :  { %p1174_p9 = pnand %p1173_p8, %p1167_p5 }
  0x32   :  { %1177 = shalt.err (!%p1174_p9)
}
  0x33   :  { %s1213_s1 = smov 64   ;;  %s1214_s10 = smov 4  }
  0x34   :  { %53 = dma.hbm_to_vmem [thread:$0]  %s1382_s4, 3072, %s48_s25, [#allocation6], %s1213_s1, %s1213_s1, %s1214_s10  }
  0x35   :  { %1200 = dma.done.wait [#allocation3], 768  }
  0x36   :  { %1201 = vsyncadd [#allocation3], 4294966528 }
  0x37   :  { %1202 = dma.done.wait [#allocation6], 6912  }
  0x38   :  { %1203 = vsyncadd [#allocation6], 4294960384  ;;  %v1215_v0 = vmov 0   ;;  %vm88_vm0 = vsmask.f32 7424  ;;  %v1298_v1 = vld [vmem:[%s1378_s0] sm:$0xff]  }
  0x39   :  { %451 = vmatprep.subr.bf16.mxu1 %v1215_v0  ;;  %vm128_vm1 = vsmask.f32 6400  ;;  %v1303_v2 = vld [vmem:[%s1378_s0 + $0x8] ss:$0 sps:$4 sm:$0x33]   ;;  %vm117_vm2 = vcmask 1046528  }
  0x3a   :  { %v1308_v3 = vld [vmem:[%s1378_s0 + $0xc] sm:$0xff]   ;;  %v90_v4 = vshrl.u32 %v1298_v1, 16  ;;  %v92_v5 = vshll.u32 %v1298_v1, 16  ;;  %v97_v6 = vshll.u32 %v1303_v2, 16  ;;  %v132_v7 = vshrl.u32 %v1303_v2, 16  ;;  %s1217_s20 = smov 96  }
  0x3b   :  { %v118_v8 = vrot.slane %v1298_v1, 1  ;;  %v119_v9 = vrot.slane %v1303_v2, 1  ;;  %v1319_v10 = vld [vmem:[%s1378_s0 + $0x14] ss:$0 sps:$4 sm:$0x33]   ;;  %v102_v11 = vshrl.u32 %v1308_v3, 16 }
  0x3c   :  { %v94_v12 = vrot.slane %v92_v5, 1  ;;  %v99_v13 = vrot.slane %v97_v6, 1  ;;  %v129_v14 = vrot.slane %v90_v4, 1  ;;  %v130_v15 = vrot.slane %v92_v5, 2  ;;  %v1044_v16 = vld [vmem:[#allocation5 + $0x4] ss:$12 sps:$4 sm:$0xff]  }
  0x3d   :  { %v134_v17 = vrot.slane %v132_v7, 1  ;;  %v135_v18 = vrot.slane %v97_v6, 2  ;;  %v104_v19 = vshll.u32 %v1308_v3, 16  ;;  %v1046_v20 = vld [vmem:[#allocation5] ss:$12 sps:$4 sm:$0xff]   ;;  %v109_v23 = vshll.u32 %v1319_v10, 16  ;;  %398 = vmatprep.subr.bf16.mxu0 %v1044_v16 }
  0x3e   :  { %v95_v21 = vor.u32 %v94_v12, %v90_v4  ;;  %v131_v22 = vor.u32 %v130_v15, %v129_v14  ;;  %v121_v24 = vrot.slane %v1308_v3, 1  ;;  %v122_v27 = vrot.slane %v1319_v10, 1  ;;  %399 = vmatpush1.bf16.msra.mxu0 %v1046_v20  ;;  %v1047_v29 = vld [vmem:[#allocation5 + $0x8] ss:$12 sps:$4 sm:$0xff]   ;;  %s1216_s0 = smov 32  }
  0x3f   :  { %v136_v25 = vor.u32 %v135_v18, %v134_v17  ;;  %v106_v26 = vrot.slane %v104_v19, 1  ;;  %v138_v28 = vrot.slane %v102_v11, 1  ;;  %v111_v31 = vrot.slane %v109_v23, 1  ;;  %v1048_v34 = vld [vmem:[#allocation5 + $0x1c] ss:$12 sps:$4 sm:$0xff]   ;;  %452 = vmatpush1.bf16.msra.mxu1 %v1047_v29  ;;  %v1086_v29 = vld [vmem:[#allocation7] sm:$0xff]  }
  0x40   :  { %v100_v30 = vsel %vm88_vm0, %v95_v21, %v99_v13  ;;  %v139_v32 = vrot.slane %v104_v19, 2  ;;  %v141_v33 = vshrl.u32 %v1319_v10, 16  ;;  %v144_v37 = vrot.slane %v109_v23, 2  ;;  %v1050_v38 = vld [vmem:[#allocation5 + $0x18] ss:$12 sps:$4 sm:$0xff]   ;;  %400 = vmatprep.subr.bf16.mxu0 %v1048_v34  ;;  %453 = vmatprep.subr.bf16.mxu1 %v1215_v0 }
  0x41   :  { %113 = vrot.lane.b32.xlu0 %v100_v30, %s1216_s0  ;;  %v137_v35 = vsel %vm128_vm1, %v131_v22, %v136_v25  ;;  %v107_v36 = vor.u32 %v106_v26, %v102_v11  ;;  %v120_v39 = vsel %vm117_vm2, %v118_v8, %v119_v9  ;;  %v1051_v41 = vld [vmem:[#allocation5 + $0x20] ss:$12 sps:$4 sm:$0xff]   ;;  %v1054_v45 = vld [vmem:[#allocation5 + $0x30] ss:$12 sps:$4 sm:$0xff]   ;;  %vm151_vm3 = vcmask 1045504  }
  0x42   :  { %147 = vrot.lane.b32.xlu1 %v137_v35, %s1217_s20  ;;  %v143_v40 = vrot.slane %v141_v33, 1  ;;  %v140_v43 = vor.u32 %v139_v32, %v138_v28  ;;  %401 = vmatpush1.bf16.msra.mxu0 %v1050_v38  ;;  %v1052_v44 = vld [vmem:[#allocation5 + $0x34] ss:$12 sps:$4 sm:$0xff]   ;;  %v152_v47 = vrot.slane %v1298_v1, 2  ;;  %v1055_v48 = vld [vmem:[#allocation5 + $0x38] ss:$12 sps:$4 sm:$0xff]   ;;  %v123_v50 = vsel %vm117_vm2, %v121_v24, %v122_v27 }
  0x43   :  { %v112_v42 = vsel %vm88_vm0, %v107_v36, %v111_v31  ;;  %454 = vmatpush1.bf16.msra.mxu1 %v1051_v41  ;;  %v1056_v49 = vld [vmem:[#allocation5 + $0x4c] ss:$12 sps:$4 sm:$0xff]   ;;  %402 = vmatprep.subr.bf16.mxu0 %v1052_v44  ;;  %v153_v51 = vrot.slane %v1303_v2, 2  ;;  %v1058_v53 = vld [vmem:[#allocation5 + $0x48] ss:$12 sps:$4 sm:$0xff]   ;;  %v155_v57 = vrot.slane %v1308_v3, 2 }
  0x44   :  { %v145_v46 = vor.u32 %v144_v37, %v143_v40  ;;  %455 = vmatprep.subr.bf16.mxu1 %v1215_v0  ;;  %v1060_v54 = vld [vmem:[#allocation5 + $0x64] ss:$12 sps:$4 sm:$0xff]   ;;  %v156_v58 = vrot.slane %v1319_v10, 2  ;;  %vm158_vm4 = vcmask 261120   ;;  %v1062_v59 = vld [vmem:[#allocation5 + $0x60] ss:$12 sps:$4 sm:$0xff]  }
  0x45   :  { %124 = vrot.lane.b32.xlu0 %v120_v39, %s1213_s1  ;;  %v154_v55 = vsel %vm151_vm3, %v152_v47, %v153_v51  ;;  %v1059_v56 = vld [vmem:[#allocation5 + $0x50] ss:$12 sps:$4 sm:$0xff]   ;;  %v1063_v62 = vld [vmem:[#allocation5 + $0x68] ss:$12 sps:$4 sm:$0xff]   ;;  %v1066_v63 = vld [vmem:[#allocation5 + $0x78] ss:$12 sps:$4 sm:$0xff]  }
  0x46   :  { %115 = vrot.lane.b32.xlu1 %v112_v42, %s1216_s0  ;;  %v146_v52 = vsel %vm128_vm1, %v140_v43, %v145_v46  ;;  %403 = vmatpush1.bf16.msra.mxu0 %v1054_v45  ;;  %v157_v60 = vsel %vm151_vm3, %v155_v57, %v156_v58  ;;  %v1064_v61 = vld [vmem:[#allocation5 + $0x7c] ss:$12 sps:$4 sm:$0xff]   ;;  %v1068_v2 = vld [vmem:[#allocation5 + $0x94] ss:$12 sps:$4 sm:$0xff]   ;;  %v1071_v6 = vld [vmem:[#allocation5 + $0x98] ss:$12 sps:$4 sm:$0xff]  }
  0x47   :  { %404 = vmatprep.subr.bf16.mxu0 %v1056_v49  ;;  %456 = vmatpush1.bf16.msra.mxu1 %v1055_v48  ;;  %v1067_v4 = vld [vmem:[#allocation5 + $0x80] ss:$12 sps:$4 sm:$0xff]   ;;  %v1070_v5 = vld [vmem:[#allocation5 + $0x90] ss:$12 sps:$4 sm:$0xff]   ;;  %v1074_v8 = vld [vmem:[#allocation5 + $0xa8] ss:$12 sps:$4 sm:$0xff]  }
  0x48   :  { %457 = vmatprep.subr.bf16.mxu1 %v1215_v0  ;;  %945 = vmatprep.mubr.msk.bf16.mxu0 %vm158_vm4, %v154_v55  ;;  %v1072_v7 = vld [vmem:[#allocation5 + $0xac] ss:$12 sps:$4 sm:$0xff]   ;;  %v1076_v9 = vld [vmem:[#allocation5 + $0xc4] ss:$12 sps:$4 sm:$0xff]   ;;  %v1080_v12 = vld [vmem:[#allocation5 + $0xdc] ss:$12 sps:$4 sm:$0xff]  }
  0x49   :  { %126 = vrot.lane.b32.xlu0 %v123_v50, %s1213_s1  ;;  %947 = vmatprep.mubr.msk.bf16.mxu1 %vm158_vm4, %v154_v55  ;;  %v1075_v10 = vld [vmem:[#allocation5 + $0xb0] ss:$12 sps:$4 sm:$0xff]   ;;  %v1078_v11 = vld [vmem:[#allocation5 + $0xc0] ss:$12 sps:$4 sm:$0xff]   ;;  %v1079_v13 = vld [vmem:[#allocation5 + $0xc8] ss:$12 sps:$4 sm:$0xff]   ;;  %v217_v50 = vlaneseq }
  0x4a   :  { %149 = vrot.lane.b32.xlu1 %v146_v52, %s1217_s20  ;;  %405 = vmatpush1.bf16.msra.mxu0 %v1058_v53  ;;  %v1082_v14 = vld [vmem:[#allocation5 + $0xd8] ss:$12 sps:$4 sm:$0xff]   ;;  %v1083_v15 = vld [vmem:[#allocation5 + $0xe0] ss:$12 sps:$4 sm:$0xff]   ;;  %vm163_vm5 = vcmask 523264   ;;  %vm168_vm6 = vcmask 785408  }
  0x4b   :  { %406 = vmatprep.subr.bf16.mxu0 %v1060_v54  ;;  %458 = vmatpush1.bf16.msra.mxu1 %v1059_v56  ;;  %v1218_v27 = vmov 0.0   ;;  %v1085_v28 = vld [vmem:[#allocation7 + $0x40] sm:$0xff]   ;;  %v1088_v30 = vld [vmem:[#allocation7 + $0x48] sm:$0xff]   ;;  %v1090_v32 = vld [vmem:[#allocation7 + $0x90] sm:$0xff]   ;;  %vm1219_vm7 = vmmov 0   ;;  %v218_v51 = vshrl.u32 %v217_v50, 7 }
  0x4c   :  { %459 = vmatprep.subr.bf16.mxu1 %v1215_v0  ;;  %v1089_v31 = vld [vmem:[#allocation7 + $0x8] sm:$0xff]   ;;  %v1091_v33 = vld [vmem:[#allocation7 + $0x50] sm:$0xff]   ;;  %v1093_v35 = vld [vmem:[#allocation7 + $0x98] sm:$0xff]   ;;  %vm645_vm8 = vcmask 1041409   ;;  %vm879_vm9 = vcmask 1041408  }
  0x4d   :  { %v1092_v34 = vld [vmem:[#allocation7 + $0x10] sm:$0xff]   ;;  %v1094_v36 = vld [vmem:[#allocation7 + $0x58] sm:$0xff]   ;;  %v1096_v38 = vld [vmem:[#allocation7 + $0xa0] sm:$0xff]   ;;  %v219_v52 = vsub.s32 0, %v218_v51  ;;  %v227_v53 = vsub.s32 2, %v218_v51  ;;  %v223_v55 = vsub.s32 1, %v218_v51 }
  0x4e   :  { %407 = vmatpush1.bf16.msra.mxu0 %v1062_v59  ;;  %v1095_v37 = vld [vmem:[#allocation7 + $0x18] sm:$0xff]   ;;  %v1097_v39 = vld [vmem:[#allocation7 + $0x60] sm:$0xff]   ;;  %v1099_v41 = vld [vmem:[#allocation7 + $0xa8] sm:$0xff]  }
  0x4f   :  { %408 = vmatprep.subr.bf16.mxu0 %v1064_v61  ;;  %460 = vmatpush1.bf16.msra.mxu1 %v1063_v62  ;;  %v1098_v40 = vld [vmem:[#allocation7 + $0x20] sm:$0xff]   ;;  %v1100_v42 = vld [vmem:[#allocation7 + $0x68] sm:$0xff]   ;;  %v1102_v44 = vld [vmem:[#allocation7 + $0xb0] sm:$0xff]  }
  0x50   :  { %461 = vmatprep.subr.bf16.mxu1 %v1215_v0  ;;  %v1101_v43 = vld [vmem:[#allocation7 + $0x28] sm:$0xff]   ;;  %v1103_v45 = vld [vmem:[#allocation7 + $0x70] sm:$0xff]   ;;  %v1105_v47 = vld [vmem:[#allocation7 + $0xb8] sm:$0xff]  }
  0x51   :  { %v1104_v46 = vld [vmem:[#allocation7 + $0x30] sm:$0xff]   ;;  %v1106_v48 = vld [vmem:[#allocation7 + $0x78] sm:$0xff]   ;;  %v215_v54 = vld [vmem:[%s1381_s3] sm:$0x7] }
  0x52   :  { %409 = vmatpush1.bf16.msra.mxu0 %v1066_v63  ;;  %v1107_v49 = vld [vmem:[#allocation7 + $0x38] sm:$0xff]   ;;  %v220_v56 = vrot.slane %v215_v54, %v219_v52  ;;  %v228_v57 = vrot.slane %v215_v54, %v227_v53  ;;  %v224_v58 = vrot.slane %v215_v54, %v223_v55 }
  0x53   :  { %410 = vmatprep.subr.bf16.mxu0 %v1068_v2  ;;  %462 = vmatpush1.bf16.msra.mxu1 %v1067_v4 }
  0x54   :  { %463 = vmatprep.subr.bf16.mxu1 %v1215_v0 }
  0x56   :  { %411 = vmatpush1.bf16.msra.mxu0 %v1070_v5 }
  0x57   :  { %412 = vmatprep.subr.bf16.mxu0 %v1072_v7  ;;  %464 = vmatpush1.bf16.msra.mxu1 %v1071_v6 }
  0x58   :  { %465 = vmatprep.subr.bf16.mxu1 %v1215_v0 }
  0x5a   :  { %413 = vmatpush1.bf16.msra.mxu0 %v1074_v8  ;;  %v512_v8 = vld [vmem:[#allocation2] sm:$0xff] }
  0x5b   :  { %414 = vmatprep.subr.bf16.mxu0 %v1076_v9  ;;  %466 = vmatpush1.bf16.msra.mxu1 %v1075_v10 }
  0x5c   :  { %467 = vmatprep.subr.bf16.mxu1 %v1215_v0 }
  0x5e   :  { %415 = vmatpush1.bf16.msra.mxu0 %v1078_v11 }
  0x5f   :  { %416 = vmatprep.subr.bf16.mxu0 %v1080_v12  ;;  %468 = vmatpush1.bf16.msra.mxu1 %v1079_v13 }
  0x60   :  { %469 = vmatprep.subr.bf16.mxu1 %v1215_v0 }
  0x62   :  { %417 = vmatpush1.bf16.msra.mxu0 %v1082_v14  ;;  %v514_v14 = vld [vmem:[#allocation2 + $0x10] sm:$0xff] }
  0x63   :  { %470 = vmatpush1.bf16.msra.mxu1 %v1083_v15  ;;  %974 = vmatprep.subr.bf16.mxu0 %v1085_v28 }
  0x64   :  { %1005 = vmatprep.subr.bf16.mxu1 %v1218_v27 }
  0xb3   :  { %v114_v16 = vpop.permute.xlu0 %113 }
  0xb4   :  { %v148_v17 = vpop.permute.xlu1 %147  ;;  %v160_v18 = vsel %vm158_vm4, %v1298_v1, %v114_v16  ;;  %v1084_v1 = vld [vmem:[#allocation7 + $0x80] sm:$0xff]   ;;  %v515_v16 = vld [vmem:[#allocation2 + $0x18] sm:$0xff] }
  0xb7   :  { %v125_v19 = vpop.permute.xlu0 %124 }
  0xb8   :  { %v165_v20 = vsel %vm163_vm5, %v160_v18, %v125_v19  ;;  %v116_v21 = vpop.permute.xlu1 %115  ;;  %v513_v19 = vld [vmem:[#allocation2 + $0x8] sm:$0xff] }
  0xb9   :  { %v170_v22 = vsel %vm168_vm6, %v165_v20, %v148_v17  ;;  %v162_v23 = vsel %vm158_vm4, %v1308_v3, %v116_v21  ;;  %v1087_v3 = vld [vmem:[#allocation7 + $0x88] sm:$0xff]  }
  0xba   :  { %431 = vmatmul.mubr.bf16.vlgmr.msra.gmra.mrb[0].mxu0 %v170_v22  ;;  %484 = vmatmul.mubr.bf16.vlgmr.msra.gmra.mrb[0].mxu1 %v170_v22  ;;  %v517_v17 = vld [vmem:[#allocation2 + $0x28] sm:$0xff]  ;;  %v516_v22 = vld [vmem:[#allocation2 + $0x20] sm:$0xff] }
  0xbb   :  { %v127_v24 = vpop.permute.xlu0 %126  ;;  %946 = vmatprep.mubr.msk.bf16.mxu0 %vm158_vm4, %v157_v60  ;;  %948 = vmatprep.mubr.msk.bf16.mxu1 %vm158_vm4, %v157_v60 }
  0xbc   :  { %v167_v0 = vsel %vm163_vm5, %v162_v23, %v127_v24  ;;  %v150_v25 = vpop.permute.xlu1 %149  ;;  %1006 = vmatpush3.bf16.msra.mxu1 %v1084_v1  ;;  %975 = vmatpush3.bf16.msra.mxu0 %v1086_v29 }
  0xbd   :  { %v173_v26 = vsel %vm168_vm6, %v167_v0, %v150_v25  ;;  %1007 = vmatprep.subr.bf16.mxu1 %v1218_v27  ;;  %976 = vmatprep.subr.bf16.mxu0 %v1088_v30 }
  0xc0   :  { %1008 = vmatpush3.bf16.msra.mxu1 %v1087_v3  ;;  %977 = vmatpush3.bf16.msra.mxu0 %v1089_v31 }
  0xc1   :  { %1009 = vmatprep.subr.bf16.mxu1 %v1218_v27  ;;  %978 = vmatprep.subr.bf16.mxu0 %v1091_v33 }
  0xc2   :  { %441 = vmatmul.mubr.bf16.gmra.mrb[4].mxu0 %v173_v26  ;;  %492 = vmatmul.mubr.bf16.gmra.mrb[4].mxu1 %v173_v26 }
  0xc3   :  { %1021 = vmatprep.mubr.msk.bf16.mxu1 %vm1219_vm7, %v1218_v27 }
  0xc4   :  { %1010 = vmatpush3.bf16.msra.mxu1 %v1090_v32  ;;  %979 = vmatpush3.bf16.msra.mxu0 %v1092_v34 }
  0xc5   :  { %1011 = vmatprep.subr.bf16.mxu1 %v1218_v27  ;;  %980 = vmatprep.subr.bf16.mxu0 %v1094_v36 }
  0xc8   :  { %1012 = vmatpush3.bf16.msra.mxu1 %v1093_v35  ;;  %981 = vmatpush3.bf16.msra.mxu0 %v1095_v37 }
  0xc9   :  { %1013 = vmatprep.subr.bf16.mxu1 %v1218_v27  ;;  %982 = vmatprep.subr.bf16.mxu0 %v1097_v39 }
  0xcc   :  { %1014 = vmatpush3.bf16.msra.mxu1 %v1096_v38  ;;  %983 = vmatpush3.bf16.msra.mxu0 %v1098_v40 }
  0xcd   :  { %1015 = vmatprep.subr.bf16.mxu1 %v1218_v27  ;;  %984 = vmatprep.subr.bf16.mxu0 %v1100_v42 }
  0xd0   :  { %1016 = vmatpush3.bf16.msra.mxu1 %v1099_v41  ;;  %985 = vmatpush3.bf16.msra.mxu0 %v1101_v43 }
  0xd1   :  { %1017 = vmatprep.subr.bf16.mxu1 %v1218_v27  ;;  %986 = vmatprep.subr.bf16.mxu0 %v1103_v45 }
  0xd4   :  { %1018 = vmatpush3.bf16.msra.mxu1 %v1102_v44  ;;  %987 = vmatpush3.bf16.msra.mxu0 %v1104_v46 }
  0xd5   :  { %1019 = vmatprep.subr.bf16.mxu1 %v1218_v27  ;;  %988 = vmatprep.subr.bf16.mxu0 %v1106_v48 }
  0xd8   :  { %1020 = vmatpush3.bf16.msra.mxu1 %v1105_v47  ;;  %989 = vmatpush3.bf16.msra.mxu0 %v1107_v49 }
 0x18d   :  { %v432_v59 = vpop.f32.mrb[0].mxu0  ;;  %v485_v60 = vpop.f32.mrb[0].mxu1 }
 0x18e   :  { %v433_v61 = vadd.f32 %v432_v59, %v220_v56  ;;  %v486_v62 = vadd.f32 %v485_v60, %v228_v57  ;;  %v434_v63 = vpop.f32.mrb[1].mxu0  ;;  %v487_v2 = vpop.f32.mrb[1].mxu1 }
 0x18f   :  { %v435_v4 = vadd.f32 %v434_v63, %v224_v58  ;;  %v436_v5 = vpop.f32.mrb[2].mxu0  ;;  %v488_v6 = vpop.f32.mrb[2].mxu1 }
 0x190   :  { %v500_v7 = vmax.f32 %v433_v61, 0.0  ;;  %v502_v9 = vmax.f32 %v486_v62, 0.0  ;;  %v437_v10 = vadd.f32 %v436_v5, %v220_v56  ;;  %v489_v11 = vadd.f32 %v488_v6, %v228_v57  ;;  %v438_v12 = vpop.f32.mrb[3].mxu0  ;;  %v490_v13 = vpop.f32.mrb[3].mxu1 }
 0x191   :  { %v501_v15 = vmax.f32 %v435_v4, 0.0  ;;  %v439_v18 = vadd.f32 %v438_v12, %v224_v58 }
 0x192   :  { %v503_v20 = vmax.f32 %v437_v10, 0.0  ;;  %v505_v21 = vmax.f32 %v489_v11, 0.0  ;;  %v518_v24 = vmul.f32 %v512_v8, %v500_v7  ;;  %v520_v0 = vmul.f32 %v514_v14, %v502_v9 }
 0x193   :  { %v504_v23 = vmax.f32 %v439_v18, 0.0  ;;  %v519_v1 = vmul.f32 %v513_v19, %v501_v15 }
 0x194   :  { %v521_v25 = vmul.f32 %v515_v16, %v503_v20  ;;  %v523_v26 = vmul.f32 %v517_v17, %v505_v21 }
 0x195   :  { %v522_v27 = vmul.f32 %v516_v22, %v504_v23  ;;  %v442_v28 = vpop.f32.mrb[4].mxu0  ;;  %v493_v29 = vpop.f32.mrb[4].mxu1 }
 0x196   :  { %v530_v3 = vmax.f32 %v518_v24, %v521_v25  ;;  %v544_v30 = vmax.f32 %v520_v0, %v523_v26  ;;  %v443_v31 = vadd.f32 %v442_v28, %v220_v56  ;;  %v494_v32 = vadd.f32 %v493_v29, %v228_v57  ;;  %v444_v33 = vpop.f32.mrb[5].mxu0  ;;  %v495_v34 = vpop.f32.mrb[5].mxu1 }
 0x197   :  { %v537_v35 = vmax.f32 %v519_v1, %v522_v27  ;;  %v446_v36 = vpop.f32.mrb[6].mxu0  ;;  %v496_v37 = vpop.f32.mrb[6].mxu1  ;;  %v445_v41 = vadd.f32 %v444_v33, %v224_v58 }
 0x198   :  { %v531_v38 = vrot.slane %v530_v3, 4  ;;  %v545_v39 = vrot.slane %v544_v30, 4  ;;  %v506_v40 = vmax.f32 %v443_v31, 0.0  ;;  %v448_v42 = vpop.f32.mrb[7].mxu0  ;;  %v498_v43 = vpop.f32.mrb[7].mxu1  ;;  %v508_v45 = vmax.f32 %v494_v32, 0.0 }
 0x199   :  { %v538_v44 = vrot.slane %v537_v35, 4  ;;  %v447_v46 = vadd.f32 %v446_v36, %v220_v56  ;;  %v497_v47 = vadd.f32 %v496_v37, %v228_v57  ;;  %v507_v55 = vmax.f32 %v445_v41, 0.0 }
 0x19a   :  { %v532_v48 = vmax.f32 %v530_v3, %v531_v38  ;;  %v546_v49 = vmax.f32 %v544_v30, %v545_v39  ;;  %v449_v59 = vadd.f32 %v448_v42, %v224_v58  ;;  %v524_v60 = vmul.f32 %v512_v8, %v506_v40 }
 0x19b   :  { %v539_v50 = vmax.f32 %v537_v35, %v538_v44  ;;  %v509_v51 = vmax.f32 %v447_v46, 0.0  ;;  %v511_v52 = vmax.f32 %v497_v47, 0.0  ;;  %v526_v61 = vmul.f32 %v514_v14, %v508_v45 }
 0x19c   :  { %v533_v53 = vrot.slane %v532_v48, 2  ;;  %v547_v54 = vrot.slane %v546_v49, 2  ;;  %v510_v4 = vmax.f32 %v449_v59, 0.0  ;;  %v525_v57 = vmul.f32 %v513_v19, %v507_v55 }
 0x19d   :  { %v527_v62 = vmul.f32 %v515_v16, %v509_v51  ;;  %v529_v63 = vmul.f32 %v517_v17, %v511_v52  ;;  %v540_v2 = vrot.slane %v539_v50, 2 }
 0x19e   :  { %v534_v5 = vmax.f32 %v532_v48, %v533_v53  ;;  %v548_v6 = vmax.f32 %v546_v49, %v547_v54  ;;  %v528_v9 = vmul.f32 %v516_v22, %v510_v4  ;;  %v949_v54 = vld [vmem:[%s1383_s5] ss:$0 sm:$0xff]  ;;  %s1220_s5 = smov [#allocation8]  }
 0x19f   :  { %v551_v7 = vmax.f32 %v524_v60, %v527_v62  ;;  %v565_v56 = vmax.f32 %v526_v61, %v529_v63  ;;  %v541_v12 = vmax.f32 %v539_v50, %v540_v2  ;;  %s901_s23 = sshll.u32 %s1220_s5, 4  ;;  %s902_s23 = int_to_ptr.vmem [resolvable:$true] %s901_s23 }
 0x1a0   :  { %v558_v13 = vmax.f32 %v525_v57, %v528_v9  ;;  %v535_v15 = vrot.slane %v534_v5, 1  ;;  %v549_v18 = vrot.slane %v548_v6, 1  ;;  %s1178_s24 = scalar_lea.vmem %s902_s23, 32  ;;  %p1183_p11 = scmp.lt.s32.totalorder %s902_s23, %s902_s23 }
 0x1a1   :  { %v552_v10 = vrot.slane %v551_v7, 4  ;;  %v566_v11 = vrot.slane %v565_v56, 4  ;;  %v542_v17 = vrot.slane %v541_v12, 1  ;;  %p1179_p10 = scmp.ne.s32.totalorder %s902_s23, %s1178_s24  ;;  %p1184_p12 = scmp.lt.s32.totalorder %s1178_s24, %s1178_s24 }
 0x1a2   :  { %v559_v8 = vrot.slane %v558_v13, 4  ;;  %v536_v23 = vmax.f32 %v534_v5, %v535_v15  ;;  %v550_v24 = vmax.f32 %v548_v6, %v549_v18 }
 0x1a3   :  { %v553_v20 = vmax.f32 %v551_v7, %v552_v10  ;;  %v567_v58 = vmax.f32 %v565_v56, %v566_v11  ;;  %v543_v27 = vmax.f32 %v541_v12, %v542_v17  ;;  %p1185_p13 = por %p1184_p12, %p1183_p11 }
 0x1a4   :  { %v560_v21 = vmax.f32 %v558_v13, %v559_v8  ;;  %v572_v28 = vpack.c.bf16 %v536_v23, %v536_v23  ;;  %v574_v29 = vpack.c.bf16 %v550_v24, %v550_v24 }
 0x1a5   :  { %v554_v14 = vrot.slane %v553_v20, 2  ;;  %v568_v16 = vrot.slane %v567_v58, 2  ;;  %v573_v35 = vpack.c.bf16 %v543_v27, %v543_v27  ;;  %p1186_p0 = pnand %p1185_p13, %p1179_p10 }
 0x1a6   :  { %v561_v26 = vrot.slane %v560_v21, 2  ;;  %v639_v36 = vunpack.c.l.b16 %v572_v28  ;;  %v641_v37 = vunpack.c.l.b16 %v574_v29 }
 0x1a7   :  { %v555_v0 = vmax.f32 %v553_v20, %v554_v14  ;;  %v569_v25 = vmax.f32 %v567_v58, %v568_v16  ;;  %v640_v44 = vunpack.c.l.b16 %v573_v35 }
 0x1a8   :  { %v562_v1 = vmax.f32 %v560_v21, %v561_v26 }
 0x1a9   :  { %v556_v19 = vrot.slane %v555_v0, 1  ;;  %v570_v22 = vrot.slane %v569_v25, 1 }
 0x1aa   :  { %v563_v31 = vrot.slane %v562_v1, 1 }
 0x1ab   :  { %v557_v3 = vmax.f32 %v555_v0, %v556_v19  ;;  %v571_v30 = vmax.f32 %v569_v25, %v570_v22 }
 0x1ac   :  { %v564_v34 = vmax.f32 %v562_v1, %v563_v31 }
 0x1ad   :  { %v575_v32 = vpack.c.bf16 %v557_v3, %v557_v3  ;;  %v577_v33 = vpack.c.bf16 %v571_v30, %v571_v30 }
 0x1ae   :  { %v576_v40 = vpack.c.bf16 %v564_v34, %v564_v34 }
 0x1af   :  { %v642_v38 = vunpack.c.l.b16 %v575_v32  ;;  %v644_v39 = vunpack.c.l.b16 %v577_v33 }
 0x1b0   :  { %v643_v45 = vunpack.c.l.b16 %v576_v40 }
 0x1b1   :  { %v648_v41 = vsel %vm645_vm8, %v644_v39, %v641_v37  ;;  %v646_v42 = vsel %vm645_vm8, %v642_v38, %v639_v36 }
 0x1b2   :  { %v651_v43 = vpack.c.b16 %v648_v41, %v648_v41  ;;  %v647_v46 = vsel %vm645_vm8, %v643_v45, %v640_v44  ;;  %v649_v48 = vpack.c.b16 %v646_v42, %v646_v42 }
 0x1b3   :  { %v650_v47 = vpack.c.b16 %v647_v46, %v647_v46 }
 0x1b4   :  { %1022 = vmatmul.mubr.bf16.vlgmr.msra.gmra.mrb[8].mxu1 %v651_v43 }
 0x1b5   :  { %831 = vmatprep.mubr.bf16.mxu0 %v650_v47 }
 0x1b6   :  { %832 = vmatmul.mubr.bf16.vlgmr.msra.gmra.mrb[8].mxu0 %v649_v48 }
 0x287   :  { %v873_v49 = vpop.f32.mrb[8].mxu1 }
 0x288   :  { %v1023_v50 = vpop.f32.mrb[9].mxu1 }
 0x289   :  { %v876_v51 = vpop.f32.mrb[10].mxu1  ;;  %v990_v53 = vpop.f32.mrb[8].mxu0 }
 0x28a   :  { %v1024_v52 = vpop.f32.mrb[11].mxu1  ;;  %v991_v55 = vpop.f32.mrb[9].mxu0 }
 0x28b   :  { %v992_v59 = vadd.f32 %v991_v55, %v990_v53  ;;  %v993_v60 = vpop.f32.mrb[10].mxu0 }
 0x28c   :  { %v994_v61 = vpop.f32.mrb[11].mxu0 }
 0x28d   :  { %v834_v62 = vadd.f32 %v992_v59, %v949_v54 }
 0x28f   :  { %v874_v63 = vadd.f32 %v873_v49, %v834_v62 }
 0x291   :  { %v880_v2 = vsel %vm879_vm9, %v874_v63, -inf }
 0x292   :  { %881 = vmax.xlane.f32.xlu0 %v880_v2 }
 0x31f   :  { %v882_v4 = vpop.xlane.xlu0 %881 }
 0x320   :  { %v883_v5 = vsub.f32 %v874_v63, %v882_v4 }
 0x322   :  { %v884_v6 = vmul.f32 1.442695, %v883_v5 }
 0x324   :  { %1108 = vpow2.f32 %v884_v6 }
 0x32e   :  { %v1109_v7 = vpop.eup %1108 }
 0x32f   :  { %v886_v56 = vsel %vm879_vm9, %v1109_v7, 0.0 }
 0x330   :  { %887 = vadd.xlane.f32.xlu1 %v886_v56 }
 0x3bd   :  { %v888_v57 = vpop.xlane.xlu1 %887 }
 0x3be   :  { %1110 = vrcp.f32 %v888_v57 }
 0x3c8   :  { %v1111_v9 = vpop.eup %1110 }
 0x3c9   :  { %v890_v10 = vmul.f32 %v1111_v9, %v888_v57 }
 0x3cb   :  { %v891_v11 = vsub.f32 2.0, %v890_v10 }
 0x3cd   :  { %v892_v12 = vmul.f32 %v1111_v9, %v891_v11 }
 0x3cf   :  { %v893_v13 = vmul.f32 %v1109_v7, %v892_v12 }
 0x3d1   :  { %894 = vst [vmem:[#allocation8] sm:$0x3] %v893_v13 }
 0x3d2   :  { %1189 = shalt.err (!%p1186_p0)
}
 0x3d3   :  { %s1190_s27 = scalar_lea.hbm %s1384_s6, 32 }
 0x3d4   :  { %p1191_p1 = scmp.ne.s32.totalorder %s1384_s6, %s1190_s27  ;;  %p1194_p2 = scmp.lt.u32.totalorder %s1190_s27, %s1384_s6 }
 0x3d6   :  { %p1196_p3 = pnand %p1194_p2, %p1191_p1 }
 0x3d8   :  { %1199 = shalt.err (!%p1196_p3)
}
 0x3d9   :  { %904 = dma.vmem_to_hbm [thread:$0]  %s902_s23, 32, %s1384_s6, [#allocation4]  }
 0x3da   :  { %1204 = dma.done.wait [#allocation4], 32  }
 0x3db   :  { %1205 = vsyncadd [#allocation4], 4294967264 }
 0x3dc   :  { %908 = vsyncpa [#allocation3], 1 }
 0x3dd   :  { %909 = vsyncpa [#allocation6], 1 }
 0x3de   :  { %910 = vsyncpa [#allocation4], 1 }

</bundles_post_ra>
